<compile_context>
chip_gen: v7x
topology: tpu7x:2x2x1
jax: 0.10.0
libtpu: 0.0.40
codegen_flags: <defaults>
</compile_context>

<pallas_src>
import math
import functools

import jax
import jax.numpy as jnp
from jax.experimental import pallas as pl
from jax.experimental.pallas import tpu as pltpu


def cosine_beta_schedule(timesteps, s=0.008):
    steps = timesteps + 1
    x = jnp.linspace(0.0, float(timesteps), steps, dtype=jnp.float32)
    alphas_cumprod = jnp.cos((x / timesteps + s) / (1 + s) * math.pi * 0.5) ** 2
    alphas_cumprod = alphas_cumprod / alphas_cumprod[0]
    betas = 1.0 - alphas_cumprod[1:] / alphas_cumprod[:-1]
    return jnp.clip(betas, 0.0, 0.999)


def _diffusion_loss_kernel(C, BP,
                           data_ref,     # VMEM (C, 2*BP): [ img | noise ] along lanes
                           coef_ref,     # VMEM (4, BP):   sac / somac / p2w_scaled / t_norm
                           params_ref,   # VMEM (C, C+2):  [ w | bias | tbias ]
                           out_ref):     # SMEM (1, 1):    final scalar loss
    # per-batch coefficient rows (already gathered by t in the wrapper)
    sac_row = coef_ref[0:1, :]       # (1, BP)
    somac_row = coef_ref[1:2, :]     # (1, BP)
    p2w_row = coef_ref[2:3, :]       # (1, BP)  == p2_loss_weight[t_b] / (B*C*H*W)
    tnorm_row = coef_ref[3:4, :]     # (1, BP)  == t_b / num_timesteps

    # normalize_to_neg_one_to_one + q_sample, whole batch at once
    x0 = data_ref[:, 0:BP] * 2.0 - 1.0          # (C, BP)
    noise = data_ref[:, BP:2 * BP]              # (C, BP)
    x_t = sac_row * x0 + somac_row * noise      # (C, BP)

    # synthetic denoise_fn: shared (C, C) channel mix + bias + t-conditioned bias
    w = params_ref[:, 0:C]                      # (C, C)
    bias_col = params_ref[:, C:C + 1]           # (C, 1)
    tbias_col = params_ref[:, C + 1:C + 2]      # (C, 1)
    model_out = jnp.dot(w, x_t, preferred_element_type=jnp.float32)
    model_out = model_out + bias_col + tbias_col * tnorm_row

    # objective == 'pred_noise', loss_type == 'l1': fully reduced, p2-weighted scalar
    out_ref[0, 0] = jnp.sum(jnp.abs(model_out - noise) * p2w_row)


def gaussian_diffusion_forward(img, t, noise, w, bias, tbias,
                               sqrt_alphas_cumprod,
                               sqrt_one_minus_alphas_cumprod,
                               p2_loss_weight, timesteps):
    B, C, H, W = img.shape
    P = H * W
    BP = B * P
    t = t.astype(jnp.int32)

    # layout plumbing only: (B, C, H, W) -> (C, B*P); pack img|noise into one DMA stream
    img_cbp = img.reshape(B, C, P).transpose(1, 0, 2).reshape(C, BP)
    noise_cbp = noise.reshape(B, C, P).transpose(1, 0, 2).reshape(C, BP)
    data = jnp.concatenate([img_cbp, noise_cbp], axis=1)              # (C, 2*BP)

    # t-dependent gathers ("extract") done here; mean denominators folded into the weight
    tnorm = t.astype(jnp.float32) / float(timesteps)
    sac = sqrt_alphas_cumprod[t]                                      # (B,)
    somac = sqrt_one_minus_alphas_cumprod[t]                          # (B,)
    p2w = p2_loss_weight[t] / float(B * C * P)                        # (B,)
    coef = jnp.repeat(jnp.stack([sac, somac, p2w, tnorm], axis=0), P, axis=1)  # (4, BP)

    # denoise_fn parameters packed in one tile: [ w | bias | tbias ]
    params = jnp.concatenate([w, bias[:, None], tbias[:, None]], axis=1)       # (C, C+2)

    kernel = functools.partial(_diffusion_loss_kernel, C, BP)

    loss = pl.pallas_call(
        kernel,
        out_shape=jax.ShapeDtypeStruct((1, 1), jnp.float32),
        grid=(1,),            # whole (small) batch in one step; tile rows/lanes at scale
        in_specs=[
            pl.BlockSpec((C, 2 * BP), lambda i: (0, 0)),   # packed img|noise
            pl.BlockSpec((4, BP), lambda i: (0, 0)),       # per-batch coefficient rows
            pl.BlockSpec((C, C + 2), lambda i: (0, 0)),    # [w | bias | tbias]
        ],
        out_specs=pl.BlockSpec(memory_space=pltpu.MemorySpace.SMEM),
        compiler_params=pltpu.CompilerParams(dimension_semantics=("arbitrary",)),
    )(data, coef, params)

    return loss[0, 0]


if __name__ == "__main__":
    B, C, H, W = 2, 4, 16, 16
    timesteps = 1000

    key = jax.random.PRNGKey(0)
    k_img, k_noise, k_t, k_w, k_b, k_tb = jax.random.split(key, 6)

    # inputs (image in [0, 1], as the module expects before normalization)
    img = jax.random.uniform(k_img, (B, C, H, W), dtype=jnp.float32)
    noise = jax.random.normal(k_noise, (B, C, H, W), dtype=jnp.float32)
    t = jax.random.randint(k_t, (B,), 0, timesteps)   # torch.randint equivalent (host glue)

    # deterministic synthetic denoise_fn parameters (channels -> channels)
    w = jax.random.normal(k_w, (C, C), dtype=jnp.float32) * 0.5
    bias = jax.random.normal(k_b, (C,), dtype=jnp.float32) * 0.1
    tbias = jax.random.normal(k_tb, (C,), dtype=jnp.float32) * 0.1

    # registered buffers (cosine schedule, p2_loss_weight_gamma=0, k=1)
    betas = cosine_beta_schedule(timesteps)
    alphas = 1.0 - betas
    alphas_cumprod = jnp.cumprod(alphas)
    sqrt_alphas_cumprod = jnp.sqrt(alphas_cumprod).astype(jnp.float32)
    sqrt_one_minus_alphas_cumprod = jnp.sqrt(1.0 - alphas_cumprod).astype(jnp.float32)
    p2_gamma, p2_k = 0.0, 1.0
    p2_loss_weight = ((p2_k + alphas_cumprod / (1.0 - alphas_cumprod)) ** (-p2_gamma)
                      ).astype(jnp.float32)

    loss = gaussian_diffusion_forward(img, t, noise, w, bias, tbias,
                                      sqrt_alphas_cumprod,
                                      sqrt_one_minus_alphas_cumprod,
                                      p2_loss_weight, timesteps)
    loss = jax.block_until_ready(loss)

    # pure-JAX reference of the same forward pass
    x0 = img * 2.0 - 1.0
    sac_r = sqrt_alphas_cumprod[t].reshape(B, 1, 1, 1)
    som_r = sqrt_one_minus_alphas_cumprod[t].reshape(B, 1, 1, 1)
    x_t = sac_r * x0 + som_r * noise
    tn = (t.astype(jnp.float32) / timesteps).reshape(B, 1, 1, 1)
    model_out = (jnp.einsum('oc,bchw->bohw', w, x_t)
                 + bias.reshape(1, C, 1, 1) + tn * tbias.reshape(1, C, 1, 1))
    per_b = jnp.abs(model_out - noise).reshape(B, -1).mean(-1) * p2_loss_weight[t]
    ref = per_b.mean()

    assert jnp.allclose(loss, ref, rtol=1e-4, atol=1e-5), (float(loss), float(ref))
    print("KERNEL_OK")
</pallas_src>

<mosaic_0001>
module attributes {stable_mosaic.version = 11 : i64} {
  func.func @_diffusion_loss_kernel(%arg0: i32, %arg1: memref<4x1024xf32, #tpu.memory_space<vmem>>, %arg2: memref<4x512xf32, #tpu.memory_space<vmem>>, %arg3: memref<4x6xf32, #tpu.memory_space<vmem>>, %arg4: memref<1x1xf32, #tpu.memory_space<smem>>) attributes {dimension_semantics = [#tpu.dimension_semantics<arbitrary>], iteration_bounds = array<i64: 1>, scalar_prefetch = 0 : i64, scratch_operands = 0 : i64, tpu.core_type = #tpu.core_type<tc>, window_params = [{pipeline_mode = #tpu.pipeline_mode<synchronous>, transform_indices = @transform_0, window_bounds = array<i64: 4, 1024>}, {pipeline_mode = #tpu.pipeline_mode<synchronous>, transform_indices = @transform_1, window_bounds = array<i64: 4, 512>}, {pipeline_mode = #tpu.pipeline_mode<synchronous>, transform_indices = @transform_2, window_bounds = array<i64: 4, 6>}, {transform_indices = @transform_3, window_bounds = array<i64: 1, 1>}]} {
    %c0 = arith.constant 0 : index
    %c0_0 = arith.constant 0 : index
    %0 = vector.load %arg2[%c0, %c0_0] : memref<4x512xf32, #tpu.memory_space<vmem>>, vector<1x512xf32>
    %c1 = arith.constant 1 : index
    %c0_1 = arith.constant 0 : index
    %1 = vector.load %arg2[%c1, %c0_1] : memref<4x512xf32, #tpu.memory_space<vmem>>, vector<1x512xf32>
    %c2 = arith.constant 2 : index
    %c0_2 = arith.constant 0 : index
    %2 = vector.load %arg2[%c2, %c0_2] : memref<4x512xf32, #tpu.memory_space<vmem>>, vector<1x512xf32>
    %c3 = arith.constant 3 : index
    %c0_3 = arith.constant 0 : index
    %3 = vector.load %arg2[%c3, %c0_3] : memref<4x512xf32, #tpu.memory_space<vmem>>, vector<1x512xf32>
    %c0_4 = arith.constant 0 : index
    %c0_5 = arith.constant 0 : index
    %4 = vector.load %arg1[%c0_4, %c0_5] : memref<4x1024xf32, #tpu.memory_space<vmem>>, vector<4x512xf32>
    %cst = arith.constant 2.000000e+00 : f32
    %5 = vector.broadcast %cst : f32 to vector<4x512xf32>
    %6 = arith.mulf %4, %5 : vector<4x512xf32>
    %cst_6 = arith.constant 1.000000e+00 : f32
    %7 = vector.broadcast %cst_6 : f32 to vector<4x512xf32>
    %8 = arith.subf %6, %7 : vector<4x512xf32>
    %c0_7 = arith.constant 0 : index
    %c512 = arith.constant 512 : index
    %9 = vector.load %arg1[%c0_7, %c512] : memref<4x1024xf32, #tpu.memory_space<vmem>>, vector<4x512xf32>
    %10 = vector.broadcast %0 : vector<1x512xf32> to vector<4x512xf32>
    %11 = arith.mulf %10, %8 : vector<4x512xf32>
    %12 = vector.broadcast %1 : vector<1x512xf32> to vector<4x512xf32>
    %13 = arith.mulf %12, %9 : vector<4x512xf32>
    %14 = arith.addf %11, %13 : vector<4x512xf32>
    %c0_8 = arith.constant 0 : index
    %c0_9 = arith.constant 0 : index
    %15 = vector.load %arg3[%c0_8, %c0_9] : memref<4x6xf32, #tpu.memory_space<vmem>>, vector<4x4xf32>
    %c0_10 = arith.constant 0 : index
    %c4 = arith.constant 4 : index
    %16 = vector.load %arg3[%c0_10, %c4] : memref<4x6xf32, #tpu.memory_space<vmem>>, vector<4x1xf32>
    %c0_11 = arith.constant 0 : index
    %c5 = arith.constant 5 : index
    %17 = vector.load %arg3[%c0_11, %c5] : memref<4x6xf32, #tpu.memory_space<vmem>>, vector<4x1xf32>
    %cst_12 = arith.constant dense<0.000000e+00> : vector<4x512xf32>
    %18 = tpu.matmul %15, %14, %cst_12 {dimension_numbers = #tpu.dot_dimension_numbers<[1], [0], [0], [1], [0, 0, 1, 1], [], []>} : vector<4x4xf32>, vector<4x512xf32>, vector<4x512xf32> -> vector<4x512xf32>
    %19 = vector.broadcast %16 : vector<4x1xf32> to vector<4x512xf32>
    %20 = arith.addf %18, %19 : vector<4x512xf32>
    %21 = vector.broadcast %17 : vector<4x1xf32> to vector<4x512xf32>
    %22 = vector.broadcast %3 : vector<1x512xf32> to vector<4x512xf32>
    %23 = arith.mulf %21, %22 : vector<4x512xf32>
    %24 = arith.addf %20, %23 : vector<4x512xf32>
    %25 = arith.subf %24, %9 : vector<4x512xf32>
    %26 = math.absf %25 : vector<4x512xf32>
    %27 = vector.broadcast %2 : vector<1x512xf32> to vector<4x512xf32>
    %28 = arith.mulf %26, %27 : vector<4x512xf32>
    %29 = vector.shape_cast %28 : vector<4x512xf32> to vector<1x4x512xf32>
    %cst_13 = arith.constant dense<0.000000e+00> : vector<1xf32>
    %30 = vector.multi_reduction <add>, %29, %cst_13 [1, 2] : vector<1x4x512xf32> to vector<1xf32>
    %31 = vector.shape_cast %30 : vector<1xf32> to vector<1x1x1xf32>
    %32 = vector.extract %31[0, 0, 0] : f32 from vector<1x1x1xf32>
    %c0_14 = arith.constant 0 : index
    %c0_15 = arith.constant 0 : index
    %33 = memref.load %arg4[%c0_14, %c0_15] : memref<1x1xf32, #tpu.memory_space<smem>>
    memref.store %32, %arg4[%c0_14, %c0_15] : memref<1x1xf32, #tpu.memory_space<smem>>
    return
  }
  func.func @transform_0(%arg0: i32) -> (i32, i32) {
    %c0_i32 = arith.constant 0 : i32
    %c0_i32_0 = arith.constant 0 : i32
    %c0_i32_1 = arith.constant 0 : i32
    return %c0_i32, %c0_i32_0 : i32, i32
  }
  func.func @transform_1(%arg0: i32) -> (i32, i32) {
    %c0_i32 = arith.constant 0 : i32
    %c0_i32_0 = arith.constant 0 : i32
    %c0_i32_1 = arith.constant 0 : i32
    return %c0_i32, %c0_i32_0 : i32, i32
  }
  func.func @transform_2(%arg0: i32) -> (i32, i32) {
    %c0_i32 = arith.constant 0 : i32
    %c0_i32_0 = arith.constant 0 : i32
    %c0_i32_1 = arith.constant 0 : i32
    return %c0_i32, %c0_i32_0 : i32, i32
  }
  func.func @transform_3(%arg0: i32) -> (i32, i32) {
    %c0_i32 = arith.constant 0 : i32
    %c0_i32_0 = arith.constant 0 : i32
    %c0_i32_1 = arith.constant 0 : i32
    return %c0_i32, %c0_i32_0 : i32, i32
  }
}

</mosaic_0001>

<bundles_post_ra>
// kernel: tpu_custom_call.1
= control target key start
LH: loop header
LB: loop body
LE: loop exit
PB: predicated region body
PF: predicated region fallthrough
CT: control target
= control target key end

     0   :  { %8 = vsyncpa [#allocation3], 0  ;;  %s580_s0 = inlined_call_operand.hbm [shape: f32[4,1024], index: 0, kind: input, shape index: {}]   ;;  %s581_s1 = inlined_call_operand.hbm [shape: f32[4,512], index: 1, kind: input, shape index: {}]   ;;  %s582_s2 = inlined_call_operand.vmem [shape: f32[4,6], index: 2, kind: input, shape index: {}]   ;;  %s583_s3 = inlined_call_operand.hbm [shape: f32[1,1], index: 3, kind: output, shape index: {}]  }
   0x1   :  { %9 = vsyncpa [#allocation6], 0 }
   0x2   :  { %10 = vsyncpa [#allocation4], 0  ;;  %s463_s12 = smov [#allocation2]   ;;  %s464_s14 = smov [#allocation5]  }
   0x3   :  { %s17_s13 = sshll.u32 %s463_s12, 4  ;;  %s27_s15 = sshll.u32 %s464_s14, 4  ;;  %s18_s13 = int_to_ptr.vmem [resolvable:$true] %s17_s13  ;;  %s28_s15 = int_to_ptr.vmem [resolvable:$true] %s27_s15 }
   0x4   :  { %s403_s18 = scalar_lea.hbm %s580_s0, 512 }
   0x5   :  { %p404_p0 = scmp.ne.s32.totalorder %s580_s0, %s403_s18  ;;  %p407_p1 = scmp.lt.u32.totalorder %s403_s18, %s580_s0 }
   0x7   :  { %p409_p2 = pnand %p407_p1, %p404_p0 }
   0x9   :  { %412 = shalt.err (!%p409_p2)
}
   0xa   :  { %s413_s23 = scalar_lea.vmem %s18_s13, 512  ;;  %p418_p4 = scmp.lt.s32.totalorder %s18_s13, %s18_s13 }
   0xb   :  { %p414_p3 = scmp.ne.s32.totalorder %s18_s13, %s413_s23  ;;  %p419_p5 = scmp.lt.s32.totalorder %s413_s23, %s413_s23 }
   0xd   :  { %p420_p6 = por %p419_p5, %p418_p4 }
   0xf   :  { %p421_p7 = pnand %p420_p6, %p414_p3 }
  0x11   :  { %424 = shalt.err (!%p421_p7)
}
  0x12   :  { %20 = dma.hbm_to_vmem [thread:$0]  %s580_s0, 512, %s18_s13, [#allocation3]  }
  0x13   :  { %s425_s28 = scalar_lea.hbm %s581_s1, 256 }
  0x14   :  { %p426_p8 = scmp.ne.s32.totalorder %s581_s1, %s425_s28  ;;  %p429_p9 = scmp.lt.u32.totalorder %s425_s28, %s581_s1 }
  0x16   :  { %p431_p10 = pnand %p429_p9, %p426_p8 }
  0x18   :  { %434 = shalt.err (!%p431_p10)
}
  0x19   :  { %s435_s6 = scalar_lea.vmem %s28_s15, 256  ;;  %p440_p12 = scmp.lt.s32.totalorder %s28_s15, %s28_s15 }
  0x1a   :  { %p436_p11 = scmp.ne.s32.totalorder %s28_s15, %s435_s6  ;;  %p441_p13 = scmp.lt.s32.totalorder %s435_s6, %s435_s6 }
  0x1c   :  { %p442_p0 = por %p441_p13, %p440_p12 }
  0x1e   :  { %p443_p1 = pnand %p442_p0, %p436_p11 }
  0x20   :  { %446 = shalt.err (!%p443_p1)
}
  0x21   :  { %30 = dma.hbm_to_vmem [thread:$0]  %s581_s1, 256, %s28_s15, [#allocation6]  }
  0x22   :  { %457 = dma.done.wait [#allocation3], 512  }
  0x23   :  { %458 = vsyncadd [#allocation3], 4294966784 }
  0x24   :  { %459 = dma.done.wait [#allocation6], 256  }
  0x25   :  { %460 = vsyncadd [#allocation6], 4294967040  ;;  %v55_v0 = vlaneseq  ;;  %v465_v1 = vmov 0.0   ;;  %v466_v3 = vmov 4   ;;  %v46_v10 = vld [vmem:[#allocation2] sm:$0xff]  ;;  %v521_v11 = vld [vmem:[#allocation2 + $0x10] sm:$0xff] }
  0x26   :  { %206 = vmatprep.mubr.f32.mxu0 %v465_v1  ;;  %277 = vmatprep.mubr.f32.mxu1 %v465_v1  ;;  %v39_v8 = vld [vmem:[#allocation5] ss:$4 sm:$0xf]  ;;  %v41_v9 = vld [vmem:[#allocation5 + $0x1] ss:$4 sm:$0xf]  ;;  %v527_v16 = vcombine.high %v521_v11, %v521_v11 }
  0x27   :  { %v56_v2 = vshrl.u32 %v55_v0, 7  ;;  %399 = vset.pattern.permute.xlu0 %v466_v3  ;;  %v47_v13 = vld [vmem:[#allocation2 + $0x8] sm:$0xff]  ;;  %v48_v15 = vmul.f32 2.0, %v46_v10  ;;  %v529_v18 = vld [vmem:[#allocation2 + $0x18] sm:$0xff]  ;;  %v120_v20 = vld [vmem:[%s582_s2] sm:$0xf] }
  0x28   :  { %v49_v17 = vmul.f32 2.0, %v47_v13  ;;  %v537_v21 = vcombine.high %v529_v18, %v529_v18  ;;  %123 = vperm.xlu0 %399, %v120_v20   ;;  %v467_v37 = vmov 5   ;;  %vm129_vm0 = vcmask 1043456   ;;  %v45_v45 = vld [vmem:[#allocation5 + $0x3] ss:$4 sm:$0xf] }
  0x29   :  { %v513_v4 = vsub.s32 1, %v56_v2  ;;  %v515_v5 = vsub.s32 3, %v56_v2  ;;  %v517_v6 = vsub.s32 0, %v56_v2  ;;  %v519_v7 = vsub.s32 2, %v56_v2  ;;  %s447_s11 = scalar_lea.hbm %s583_s3, 16 }
  0x2a   :  { %v383_v25 = vadd.f32 -1.0, %v48_v15  ;;  %v384_v27 = vadd.f32 -1.0, %v49_v17  ;;  %vm126_vm1 = vcmask 31744   ;;  %v43_v63 = vld [vmem:[#allocation5 + $0x2] ss:$4 sm:$0xf]  ;;  %p448_p2 = scmp.ne.s32.totalorder %s583_s3, %s447_s11  ;;  %p451_p3 = scmp.lt.u32.totalorder %s447_s11, %s583_s3 }
  0x2b   :  { %v93_v12 = vrot.slane %v41_v9, %v513_v4  ;;  %v101_v14 = vrot.slane %v41_v9, %v515_v5  ;;  %v58_v19 = vrot.slane %v39_v8, %v517_v6  ;;  %v89_v22 = vrot.slane %v41_v9, %v517_v6 }
  0x2c   :  { %v66_v23 = vrot.slane %v39_v8, %v519_v7  ;;  %v97_v24 = vrot.slane %v41_v9, %v519_v7  ;;  %v62_v26 = vrot.slane %v39_v8, %v513_v4  ;;  %v70_v28 = vrot.slane %v39_v8, %v515_v5  ;;  %400 = vset.pattern.permute.xlu0 %v467_v37  ;;  %p453_p4 = pnand %p451_p3, %p448_p2 }
  0x2d   :  { %v113_v29 = vmul.f32 %v527_v16, %v93_v12  ;;  %v115_v30 = vmul.f32 %v537_v21, %v101_v14  ;;  %v112_v31 = vmul.f32 %v89_v22, %v521_v11  ;;  %v77_v33 = vcombine.high %v383_v25, %v383_v25  ;;  %285 = vperm.xlu0 %400, %v120_v20  }
  0x2e   :  { %v114_v32 = vmul.f32 %v97_v24, %v529_v18  ;;  %v78_v34 = vcombine.high %v384_v27, %v384_v27  ;;  %v81_v35 = vmul.f32 %v383_v25, %v58_v19  ;;  %v83_v36 = vmul.f32 %v384_v27, %v66_v23 }
  0x2f   :  { %v82_v38 = vmul.f32 %v77_v33, %v62_v26  ;;  %v292_v46 = vrot.slane %v45_v45, %v517_v6  ;;  %v300_v47 = vrot.slane %v45_v45, %v519_v7  ;;  %v296_v49 = vrot.slane %v45_v45, %v513_v4 }
  0x30   :  { %v84_v39 = vmul.f32 %v78_v34, %v70_v28  ;;  %v116_v40 = vadd.f32 %v112_v31, %v81_v35  ;;  %v118_v41 = vadd.f32 %v114_v32, %v83_v36  ;;  %v304_v50 = vrot.slane %v45_v45, %v515_v5 }
  0x31   :  { %v117_v42 = vadd.f32 %v113_v29, %v82_v38  ;;  %v329_v10 = vrot.slane %v43_v63, %v517_v6  ;;  %v333_v14 = vrot.slane %v43_v63, %v513_v4  ;;  %v337_v15 = vrot.slane %v43_v63, %v519_v7 }
  0x32   :  { %v119_v43 = vadd.f32 %v115_v30, %v84_v39  ;;  %v341_v23 = vrot.slane %v43_v63, %v515_v5 }
  0x33   :  { %385 = vmatprep.subr.msk.mxu0 %vm129_vm0, %v117_v42 }
  0x34   :  { %388 = vmatprep.subr.msk.mxu1 %vm129_vm0, %v119_v43  ;;  %386 = vmatpush1.msk.msra.mxu0 %vm129_vm0, %v116_v40 }
  0x35   :  { %389 = vmatpush1.msk.msra.mxu1 %vm129_vm0, %v118_v41  ;;  %387 = vmatmul.mubr.msk.f32.vlgmr.msra.gmra.mrb[0].mxu0 %vm126_vm1, %v120_v20 }
  0x36   :  { %390 = vmatmul.mubr.msk.f32.vlgmr.msra.gmra.mrb[0].mxu1 %vm126_vm1, %v120_v20 }
  0xa7   :  { %v124_v44 = vpop.permute.xlu0 %123 }
  0xac   :  { %v286_v48 = vpop.permute.xlu0 %285 }
  0xad   :  { %v309_v51 = vmul.f32 %v292_v46, %v286_v48  ;;  %v311_v52 = vmul.f32 %v300_v47, %v286_v48  ;;  %v310_v53 = vmul.f32 %v296_v49, %v286_v48  ;;  %v312_v54 = vmul.f32 %v304_v50, %v286_v48 }
 0x108   :  { %v208_v55 = vpop.f32.mrb[0].mxu0 }
 0x109   :  { %v279_v56 = vpop.f32.mrb[0].mxu1  ;;  %v209_v57 = vadd.f32 %v208_v55, %v124_v44  ;;  %v210_v59 = vpop.f32.mrb[1].mxu0 }
 0x10a   :  { %v280_v58 = vadd.f32 %v279_v56, %v124_v44  ;;  %v281_v60 = vpop.f32.mrb[1].mxu1  ;;  %v211_v61 = vadd.f32 %v210_v59, %v124_v44 }
 0x10b   :  { %v282_v62 = vadd.f32 %v281_v60, %v124_v44  ;;  %v313_v0 = vadd.f32 %v309_v51, %v209_v57 }
 0x10c   :  { %v315_v1 = vadd.f32 %v311_v52, %v280_v58  ;;  %v314_v2 = vadd.f32 %v310_v53, %v211_v61 }
 0x10d   :  { %v316_v3 = vadd.f32 %v312_v54, %v282_v62  ;;  %v317_v8 = vsub.f32 %v313_v0, %v521_v11 }
 0x10e   :  { %v319_v9 = vsub.f32 %v315_v1, %v529_v18  ;;  %v318_v12 = vsub.f32 %v314_v2, %v527_v16 }
 0x10f   :  { %v320_v13 = vsub.f32 %v316_v3, %v537_v21  ;;  %v321_v17 = vand.u32 2147483647, %v317_v8 }
 0x110   :  { %v323_v19 = vand.u32 2147483647, %v319_v9  ;;  %v322_v20 = vand.u32 2147483647, %v318_v12 }
 0x111   :  { %v324_v22 = vand.u32 2147483647, %v320_v13  ;;  %v346_v24 = vmul.f32 %v329_v10, %v321_v17 }
 0x112   :  { %v347_v11 = vmul.f32 %v333_v14, %v322_v20  ;;  %v348_v25 = vmul.f32 %v337_v15, %v323_v19 }
 0x113   :  { %v350_v18 = vsel %vm129_vm0, %v346_v24, 0.0  ;;  %v349_v6 = vmul.f32 %v341_v23, %v324_v22 }
 0x114   :  { %v351_v16 = vsel %vm129_vm0, %v347_v11, 0.0  ;;  %v353_v21 = vsel %vm129_vm0, %v348_v25, 0.0 }
 0x115   :  { %v352_v26 = vadd.f32 %v351_v16, %v350_v18  ;;  %v355_v7 = vsel %vm129_vm0, %v349_v6, 0.0 }
 0x117   :  { %v354_v4 = vadd.f32 %v353_v21, %v352_v26 }
 0x119   :  { %v356_v27 = vadd.f32 %v355_v7, %v354_v4 }
 0x11b   :  { %357 = vadd.xlane.f32.xlu1 %v356_v27 }
 0x1a8   :  { %v358_v28 = vpop.xlane.xlu1 %357 }
 0x1a9   :  { %v359_v29 = vrot.slane %v358_v28, 4 }
 0x1ab   :  { %v360_v30 = vadd.f32 %v359_v29, %v358_v28 }
 0x1ad   :  { %v361_v5 = vrot.slane %v360_v30, 2 }
 0x1af   :  { %v362_v31 = vadd.f32 %v361_v5, %v360_v30 }
 0x1b1   :  { %v363_v32 = vrot.slane %v362_v31, 1 }
 0x1b3   :  { %v364_v33 = vadd.f32 %v363_v32, %v362_v31 }
 0x1b5   :  { %391 = vpush %v364_v33 }
 0x1e6   :  { %s392_s2 = spop %391 }
 0x1e7   :  { %367 = sst [smem:[#allocation7]] %s392_s2 }
 0x1e8   :  { %456 = shalt.err (!%p453_p4)
}
 0x1e9   :  { %s468_s16 = smov [#allocation7]  }
 0x1ea   :  { %375 = dma.smem_to_hbm %s468_s16, 16, %s583_s3, [#allocation4]  }
 0x1eb   :  { %461 = dma.done.wait [#allocation4], 16  }
 0x1ec   :  { %462 = vsyncadd [#allocation4], 4294967280 }
 0x1ed   :  { %379 = sfence }
 0x1ee   :  { %380 = vsyncpa [#allocation3], 1 }
 0x1ef   :  { %381 = vsyncpa [#allocation6], 1 }
 0x1f0   :  { %382 = vsyncpa [#allocation4], 1 }

</bundles_post_ra>
